<compile_context>
chip_gen: v7x
topology: tpu7x:2x2x1
jax: 0.10.0
libtpu: 0.0.40
codegen_flags: <defaults>
</compile_context>

<pallas_src>
import jax
import jax.numpy as jnp
from jax.experimental import pallas as pl
from jax.experimental.pallas import tpu as pltpu

LANE = 128


def _round_up(v, m):
    return ((v + m - 1) // m) * m


def fused_sage2_kernel(a_ref, inv_deg_ref, x_ref,
                       wl1_ref, wr1_ref, b1_ref,
                       wl2_ref, wr2_ref, b2_ref, o_ref):
    """Fused conv1 + ReLU + conv2 (SAGEConv, mean aggregation).

    a_ref      : [Np, Np]   bf16  un-normalized adjacency (edge counts, exact)
    inv_deg_ref: [Np, 1]    f32   1 / max(in-degree, 1)
    x_ref      : [Np, F0]   bf16  node features (zero-padded)
    wl1_ref    : [F0, F1]   bf16
    wr1_ref    : [F0, F1]   bf16
    b1_ref     : [1, F1]    f32
    wl2_ref    : [F1, F2]   bf16
    wr2_ref    : [F1, F2]   bf16
    b2_ref     : [1, F2]    f32
    o_ref      : [Np, F2]   f32
    """
    a = a_ref[...]
    x = x_ref[...]
    inv_deg = inv_deg_ref[...]                                          # [Np, 1] f32

    # ---- layer 1: h = relu((A@X)*inv_deg @ Wl1 + X @ Wr1 + b1) ----
    agg1 = jnp.dot(a, x, preferred_element_type=jnp.float32) * inv_deg  # [Np, F0] f32
    h = (jnp.dot(agg1.astype(jnp.bfloat16), wl1_ref[...],
                 preferred_element_type=jnp.float32)
         + jnp.dot(x, wr1_ref[...], preferred_element_type=jnp.float32))
    h = jnp.maximum(h + b1_ref[...], 0.0)                               # f32 epilogue
    hb = h.astype(jnp.bfloat16)

    # ---- layer 2: out = (A @ (h @ Wl2)) * inv_deg + h @ Wr2 + b2 ----
    # (cheaper association: F1 > F2, so contract h with Wl2 before A)
    z = jnp.dot(hb, wl2_ref[...],
                preferred_element_type=jnp.float32).astype(jnp.bfloat16)  # [Np, F2]
    r = jnp.dot(hb, wr2_ref[...], preferred_element_type=jnp.float32)     # [Np, F2] f32
    az = jnp.dot(a, z, preferred_element_type=jnp.float32) * inv_deg
    o_ref[...] = az + r + b2_ref[...]


def gnn_model_forward(x, edge_index, params):
    n, f0 = x.shape
    f1 = params["w_l1"].shape[1]
    f2 = params["w_l2"].shape[1]

    n_p = _round_up(n, LANE)
    f0_p = _round_up(f0, LANE)
    f1_p = _round_up(f1, LANE)
    f2_p = _round_up(f2, LANE)

    src, dst = edge_index[0], edge_index[1]

    # Exact edge-count adjacency in bf16 (no normalization sweep) + f32 inv_deg
    # built O(E) from edge_index.  Padded rows are all-zero -> aggregate to 0.
    a = jnp.zeros((n_p, n_p), jnp.bfloat16).at[dst, src].add(jnp.bfloat16(1.0))
    deg = jnp.zeros((n_p,), jnp.float32).at[dst].add(1.0)
    inv_deg = (1.0 / jnp.maximum(deg, 1.0)).reshape(n_p, 1)

    x_p = jnp.zeros((n_p, f0_p), jnp.bfloat16).at[:n, :f0].set(x.astype(jnp.bfloat16))

    def pad_w(w, rows, cols):
        out = jnp.zeros((rows, cols), jnp.bfloat16)
        return out.at[:w.shape[0], :w.shape[1]].set(w.astype(jnp.bfloat16))

    wl1 = pad_w(params["w_l1"], f0_p, f1_p)
    wr1 = pad_w(params["w_r1"], f0_p, f1_p)
    b1 = jnp.zeros((1, f1_p), jnp.float32).at[:, :f1].set(params["b_l1"].reshape(1, f1))
    wl2 = pad_w(params["w_l2"], f1_p, f2_p)
    wr2 = pad_w(params["w_r2"], f1_p, f2_p)
    b2 = jnp.zeros((1, f2_p), jnp.float32).at[:, :f2].set(params["b_l2"].reshape(1, f2))

    # Advisory cost estimate so XLA can schedule wrapper work around the call.
    flops = 2 * (n_p * n_p * f0_p            # A @ X
                 + 2 * n_p * f0_p * f1_p     # agg1@Wl1 + x@Wr1
                 + 2 * n_p * f1_p * f2_p     # h@Wl2 + h@Wr2
                 + n_p * n_p * f2_p)         # A @ z
    bytes_accessed = (2 * n_p * n_p + 2 * n_p * f0_p
                      + 2 * (2 * f0_p * f1_p + 2 * f1_p * f2_p)
                      + 4 * (n_p + f1_p + f2_p) + 4 * n_p * f2_p)

    vmem_spec = pl.BlockSpec(memory_space=pltpu.MemorySpace.VMEM)

    out_p = pl.pallas_call(
        fused_sage2_kernel,
        out_shape=jax.ShapeDtypeStruct((n_p, f2_p), jnp.float32),
        in_specs=[vmem_spec] * 9,
        out_specs=vmem_spec,
        cost_estimate=pl.CostEstimate(
            flops=flops, transcendentals=0, bytes_accessed=bytes_accessed),
        # NOTE: default scoped VMEM is plenty for this toy size; raise
        # vmem_limit_bytes here on v6e (128 MiB physical) before N_p ~ 4k,
        # and switch to the tiled/CSR path (see TODO) beyond that / on v7x.
        compiler_params=pltpu.CompilerParams(
            vmem_limit_bytes=32 * 1024 * 1024,
        ),
    )(a, inv_deg, x_p, wl1, wr1, b1, wl2, wr2, b2)

    return out_p[:n, :f2]


def init_params(key):
    # SAGEConv(16, 32) then SAGEConv(32, 16); weights stored as [Fin, Fout].
    k1, k2, k3, k4, k5, k6 = jax.random.split(key, 6)

    def glorot(k, fin, fout):
        scale = jnp.sqrt(2.0 / (fin + fout))
        return jax.random.normal(k, (fin, fout), jnp.float32) * scale

    return {
        "w_l1": glorot(k1, 16, 32),
        "w_r1": glorot(k2, 16, 32),
        "b_l1": 0.1 * jax.random.normal(k5, (1, 32), jnp.float32),
        "w_l2": glorot(k3, 32, 16),
        "w_r2": glorot(k4, 32, 16),
        "b_l2": 0.1 * jax.random.normal(k6, (1, 16), jnp.float32),
    }


if __name__ == "__main__":
    key = jax.random.PRNGKey(0)
    kx, kp = jax.random.split(key)

    num_nodes = 8
    x = jax.random.normal(kx, (num_nodes, 16), jnp.float32)

    # Deterministic small graph: ring edges in both directions -> E = 16.
    src = jnp.array([0, 1, 2, 3, 4, 5, 6, 7, 1, 2, 3, 4, 5, 6, 7, 0], jnp.int32)
    dst = jnp.array([1, 2, 3, 4, 5, 6, 7, 0, 0, 1, 2, 3, 4, 5, 6, 7], jnp.int32)
    edge_index = jnp.stack([src, dst], axis=0)  # [2, 16]

    params = init_params(kp)

    out = jax.block_until_ready(gnn_model_forward(x, edge_index, params))

    # Pure-f32 JAX reference of the PyG SAGEConv math. The kernel feeds the MXU
    # in bf16 (f32 accumulation), so tolerance is bf16-level.
    a_ref = jnp.zeros((num_nodes, num_nodes), jnp.float32).at[dst, src].add(1.0)
    a_ref = a_ref / jnp.maximum(jnp.sum(a_ref, axis=1, keepdims=True), 1.0)
    h_ref = jnp.maximum(
        a_ref @ x @ params["w_l1"] + x @ params["w_r1"] + params["b_l1"], 0.0)
    o_ref = a_ref @ h_ref @ params["w_l2"] + h_ref @ params["w_r2"] + params["b_l2"]

    assert out.shape == (num_nodes, 16)
    max_err = float(jnp.max(jnp.abs(out - o_ref)))
    assert jnp.allclose(out, o_ref, atol=5e-2, rtol=5e-2), max_err

    print("KERNEL_OK")
</pallas_src>

<mosaic_0001>
module attributes {stable_mosaic.version = 11 : i64} {
  func.func @fused_sage2_kernel(%arg0: memref<128x128xbf16, #tpu.memory_space<vmem>>, %arg1: memref<128x1xf32, #tpu.memory_space<vmem>>, %arg2: memref<128x128xbf16, #tpu.memory_space<vmem>>, %arg3: memref<128x128xbf16, #tpu.memory_space<vmem>>, %arg4: memref<128x128xbf16, #tpu.memory_space<vmem>>, %arg5: memref<1x128xf32, #tpu.memory_space<vmem>>, %arg6: memref<128x128xbf16, #tpu.memory_space<vmem>>, %arg7: memref<128x128xbf16, #tpu.memory_space<vmem>>, %arg8: memref<1x128xf32, #tpu.memory_space<vmem>>, %arg9: memref<128x128xf32, #tpu.memory_space<vmem>>) attributes {dimension_semantics = [], scalar_prefetch = 0 : i64, scratch_operands = 0 : i64, tpu.core_type = #tpu.core_type<tc>} {
    %c0 = arith.constant 0 : index
    %c0_0 = arith.constant 0 : index
    %0 = vector.load %arg0[%c0, %c0_0] : memref<128x128xbf16, #tpu.memory_space<vmem>>, vector<128x128xbf16>
    %c0_1 = arith.constant 0 : index
    %c0_2 = arith.constant 0 : index
    %1 = vector.load %arg2[%c0_1, %c0_2] : memref<128x128xbf16, #tpu.memory_space<vmem>>, vector<128x128xbf16>
    %c0_3 = arith.constant 0 : index
    %c0_4 = arith.constant 0 : index
    %2 = vector.load %arg1[%c0_3, %c0_4] : memref<128x1xf32, #tpu.memory_space<vmem>>, vector<128x1xf32>
    %cst = arith.constant dense<0.000000e+00> : vector<128x128xf32>
    %3 = tpu.matmul %0, %1, %cst {dimension_numbers = #tpu.dot_dimension_numbers<[1], [0], [0], [1], [0, 0, 1, 1], [], []>} : vector<128x128xbf16>, vector<128x128xbf16>, vector<128x128xf32> -> vector<128x128xf32>
    %4 = vector.broadcast %2 : vector<128x1xf32> to vector<128x128xf32>
    %5 = arith.mulf %3, %4 : vector<128x128xf32>
    %6 = arith.truncf %5 : vector<128x128xf32> to vector<128x128xbf16>
    %c0_5 = arith.constant 0 : index
    %c0_6 = arith.constant 0 : index
    %7 = vector.load %arg3[%c0_5, %c0_6] : memref<128x128xbf16, #tpu.memory_space<vmem>>, vector<128x128xbf16>
    %cst_7 = arith.constant dense<0.000000e+00> : vector<128x128xf32>
    %8 = tpu.matmul %6, %7, %cst_7 {dimension_numbers = #tpu.dot_dimension_numbers<[1], [0], [0], [1], [0, 0, 1, 1], [], []>} : vector<128x128xbf16>, vector<128x128xbf16>, vector<128x128xf32> -> vector<128x128xf32>
    %c0_8 = arith.constant 0 : index
    %c0_9 = arith.constant 0 : index
    %9 = vector.load %arg4[%c0_8, %c0_9] : memref<128x128xbf16, #tpu.memory_space<vmem>>, vector<128x128xbf16>
    %cst_10 = arith.constant dense<0.000000e+00> : vector<128x128xf32>
    %10 = tpu.matmul %1, %9, %cst_10 {dimension_numbers = #tpu.dot_dimension_numbers<[1], [0], [0], [1], [0, 0, 1, 1], [], []>} : vector<128x128xbf16>, vector<128x128xbf16>, vector<128x128xf32> -> vector<128x128xf32>
    %11 = arith.addf %8, %10 : vector<128x128xf32>
    %c0_11 = arith.constant 0 : index
    %c0_12 = arith.constant 0 : index
    %12 = vector.load %arg5[%c0_11, %c0_12] : memref<1x128xf32, #tpu.memory_space<vmem>>, vector<1x128xf32>
    %13 = vector.broadcast %12 : vector<1x128xf32> to vector<128x128xf32>
    %14 = arith.addf %11, %13 : vector<128x128xf32>
    %cst_13 = arith.constant 0.000000e+00 : f32
    %15 = vector.broadcast %cst_13 : f32 to vector<128x128xf32>
    %16 = arith.maximumf %14, %15 : vector<128x128xf32>
    %17 = arith.truncf %16 : vector<128x128xf32> to vector<128x128xbf16>
    %c0_14 = arith.constant 0 : index
    %c0_15 = arith.constant 0 : index
    %18 = vector.load %arg6[%c0_14, %c0_15] : memref<128x128xbf16, #tpu.memory_space<vmem>>, vector<128x128xbf16>
    %cst_16 = arith.constant dense<0.000000e+00> : vector<128x128xf32>
    %19 = tpu.matmul %17, %18, %cst_16 {dimension_numbers = #tpu.dot_dimension_numbers<[1], [0], [0], [1], [0, 0, 1, 1], [], []>} : vector<128x128xbf16>, vector<128x128xbf16>, vector<128x128xf32> -> vector<128x128xf32>
    %20 = arith.truncf %19 : vector<128x128xf32> to vector<128x128xbf16>
    %c0_17 = arith.constant 0 : index
    %c0_18 = arith.constant 0 : index
    %21 = vector.load %arg7[%c0_17, %c0_18] : memref<128x128xbf16, #tpu.memory_space<vmem>>, vector<128x128xbf16>
    %cst_19 = arith.constant dense<0.000000e+00> : vector<128x128xf32>
    %22 = tpu.matmul %17, %21, %cst_19 {dimension_numbers = #tpu.dot_dimension_numbers<[1], [0], [0], [1], [0, 0, 1, 1], [], []>} : vector<128x128xbf16>, vector<128x128xbf16>, vector<128x128xf32> -> vector<128x128xf32>
    %cst_20 = arith.constant dense<0.000000e+00> : vector<128x128xf32>
    %23 = tpu.matmul %0, %20, %cst_20 {dimension_numbers = #tpu.dot_dimension_numbers<[1], [0], [0], [1], [0, 0, 1, 1], [], []>} : vector<128x128xbf16>, vector<128x128xbf16>, vector<128x128xf32> -> vector<128x128xf32>
    %24 = vector.broadcast %2 : vector<128x1xf32> to vector<128x128xf32>
    %25 = arith.mulf %23, %24 : vector<128x128xf32>
    %26 = arith.addf %25, %22 : vector<128x128xf32>
    %c0_21 = arith.constant 0 : index
    %c0_22 = arith.constant 0 : index
    %27 = vector.load %arg8[%c0_21, %c0_22] : memref<1x128xf32, #tpu.memory_space<vmem>>, vector<1x128xf32>
    %28 = vector.broadcast %27 : vector<1x128xf32> to vector<128x128xf32>
    %29 = arith.addf %26, %28 : vector<128x128xf32>
    %c0_23 = arith.constant 0 : index
    %c0_24 = arith.constant 0 : index
    %30 = vector.load %arg9[%c0_23, %c0_24] : memref<128x128xf32, #tpu.memory_space<vmem>>, vector<128x128xf32>
    tpu.vector_store %arg9[%c0_23, %c0_24], %29 {strides = array<i32>} : memref<128x128xf32, #tpu.memory_space<vmem>>, vector<128x128xf32>,
    return
  }
}

</mosaic_0001>

<bundles_post_ra>
// kernel: tpu_custom_call.1
= control target key start
LH: loop header
LB: loop body
LE: loop exit
PB: predicated region body
PF: predicated region fallthrough
CT: control target
= control target key end

     0   :  { %14 = vsyncpa [#allocation3], 0  ;;  %s2287_s0 = inlined_call_operand.vmem [shape: bf16[128,128], index: 0, kind: input, shape index: {}]   ;;  %s2288_s1 = inlined_call_operand.vmem [shape: f32[128,1], index: 1, kind: input, shape index: {}]   ;;  %s2289_s2 = inlined_call_operand.vmem [shape: bf16[128,128], index: 2, kind: input, shape index: {}]   ;;  %s2290_s3 = inlined_call_operand.hbm [shape: bf16[128,128], index: 3, kind: input, shape index: {}]   ;;  %s2291_s4 = inlined_call_operand.hbm [shape: bf16[128,128], index: 4, kind: input, shape index: {}]   ;;  %s2292_s5 = inlined_call_operand.vmem [shape: f32[1,128], index: 5, kind: input, shape index: {}]   ;;  %s2293_s6 = inlined_call_operand.hbm [shape: bf16[128,128], index: 6, kind: input, shape index: {}]   ;;  %s2294_s7 = inlined_call_operand.hbm [shape: bf16[128,128], index: 7, kind: input, shape index: {}]   ;;  %s2295_s8 = inlined_call_operand.vmem [shape: f32[1,128], index: 8, kind: input, shape index: {}]   ;;  %s2296_s9 = inlined_call_operand.hbm [shape: f32[128,128], index: 9, kind: output, shape index: {}]  }
   0x1   :  { %15 = vsyncpa [#allocation6], 0 }
   0x2   :  { %16 = vsyncpa [#allocation9], 0 }
   0x3   :  { %17 = vsyncpa [#allocation4], 0  ;;  %s1852_s30 = smov [#allocation5]   ;;  %s1853_s11 = smov [#allocation2]  }
   0x4   :  { %s41_s10 = sshll.u32 %s1852_s30, 4  ;;  %s29_s12 = sshll.u32 %s1853_s11, 4  ;;  %s42_s10 = int_to_ptr.vmem [resolvable:$true] %s41_s10  ;;  %s1912_s12 = int_to_ptr.vmem [resolvable:$true] %s29_s12 }
   0x5   :  { %s1734_s15 = scalar_lea.hbm %s2291_s4, 1024 }
   0x6   :  { %p1735_p0 = scmp.ne.s32.totalorder %s2291_s4, %s1734_s15  ;;  %p1738_p1 = scmp.lt.u32.totalorder %s1734_s15, %s2291_s4 }
   0x8   :  { %p1740_p2 = pnand %p1738_p1, %p1735_p0 }
   0xa   :  { %1743 = shalt.err (!%p1740_p2)
}
   0xb   :  { %s1744_s20 = scalar_lea.vmem %s42_s10, 1024  ;;  %p1749_p4 = scmp.lt.s32.totalorder %s42_s10, %s42_s10 }
   0xc   :  { %p1745_p3 = scmp.ne.s32.totalorder %s42_s10, %s1744_s20  ;;  %p1750_p5 = scmp.lt.s32.totalorder %s1744_s20, %s1744_s20 }
   0xe   :  { %p1751_p6 = por %p1750_p5, %p1749_p4 }
  0x10   :  { %p1752_p7 = pnand %p1751_p6, %p1745_p3 }
  0x12   :  { %1755 = shalt.err (!%p1752_p7)
}
  0x13   :  { %s1854_s21 = smov 64   ;;  %s1855_s22 = smov 4  }
  0x14   :  { %47 = dma.hbm_to_vmem [thread:$0]  %s2291_s4, 1024, %s42_s10, [#allocation6], %s1854_s21, %s1854_s21, %s1855_s22  }
  0x15   :  { %s1756_s27 = scalar_lea.hbm %s2290_s3, 1024 }
  0x16   :  { %p1757_p8 = scmp.ne.s32.totalorder %s2290_s3, %s1756_s27  ;;  %p1760_p9 = scmp.lt.u32.totalorder %s1756_s27, %s2290_s3 }
  0x18   :  { %p1762_p10 = pnand %p1760_p9, %p1757_p8 }
  0x1a   :  { %1765 = shalt.err (!%p1762_p10)
}
  0x1b   :  { %s1766_s13 = scalar_lea.vmem %s1912_s12, 1024  ;;  %p1771_p12 = scmp.lt.s32.totalorder %s1912_s12, %s1912_s12 }
  0x1c   :  { %p1767_p11 = scmp.ne.s32.totalorder %s1912_s12, %s1766_s13  ;;  %p1772_p13 = scmp.lt.s32.totalorder %s1766_s13, %s1766_s13 }
  0x1e   :  { %p1773_p0 = por %p1772_p13, %p1771_p12 }
  0x20   :  { %p1774_p1 = pnand %p1773_p0, %p1767_p11 }
  0x22   :  { %1777 = shalt.err (!%p1774_p1)
}
  0x23   :  { %35 = dma.hbm_to_vmem [thread:$0]  %s2290_s3, 1024, %s1912_s12, [#allocation3], %s1854_s21, %s1854_s21, %s1855_s22  }
  0x24   :  { %s1856_s14 = smov [#allocation7]   ;;  %s1857_s16 = smov [#allocation8]  }
  0x25   :  { %s55_s15 = sshll.u32 %s1856_s14, 4  ;;  %s67_s17 = sshll.u32 %s1857_s16, 4  ;;  %s56_s15 = int_to_ptr.vmem [resolvable:$true] %s55_s15  ;;  %s1949_s17 = int_to_ptr.vmem [resolvable:$true] %s67_s17 }
  0x26   :  { %s1778_s20 = scalar_lea.hbm %s2293_s6, 1024 }
  0x27   :  { %p1779_p2 = scmp.ne.s32.totalorder %s2293_s6, %s1778_s20  ;;  %p1782_p3 = scmp.lt.u32.totalorder %s1778_s20, %s2293_s6 }
  0x29   :  { %p1784_p4 = pnand %p1782_p3, %p1779_p2 }
  0x2b   :  { %1787 = shalt.err (!%p1784_p4)
}
  0x2c   :  { %s1788_s3 = scalar_lea.vmem %s56_s15, 1024  ;;  %p1793_p6 = scmp.lt.s32.totalorder %s56_s15, %s56_s15 }
  0x2d   :  { %p1789_p5 = scmp.ne.s32.totalorder %s56_s15, %s1788_s3  ;;  %p1794_p7 = scmp.lt.s32.totalorder %s1788_s3, %s1788_s3 }
  0x2f   :  { %p1795_p8 = por %p1794_p7, %p1793_p6 }
  0x31   :  { %p1796_p9 = pnand %p1795_p8, %p1789_p5 }
  0x33   :  { %1799 = shalt.err (!%p1796_p9)
}
  0x34   :  { %61 = dma.hbm_to_vmem [thread:$0]  %s2293_s6, 1024, %s56_s15, [#allocation6], %s1854_s21, %s1854_s21, %s1855_s22  }
  0x35   :  { %s1800_s30 = scalar_lea.hbm %s2294_s7, 1024 }
  0x36   :  { %p1801_p10 = scmp.ne.s32.totalorder %s2294_s7, %s1800_s30  ;;  %p1804_p11 = scmp.lt.u32.totalorder %s1800_s30, %s2294_s7 }
  0x38   :  { %p1806_p12 = pnand %p1804_p11, %p1801_p10 }
  0x3a   :  { %1809 = shalt.err (!%p1806_p12)
}
  0x3b   :  { %s1810_s14 = scalar_lea.vmem %s1949_s17, 1024  ;;  %p1815_p0 = scmp.lt.s32.totalorder %s1949_s17, %s1949_s17 }
  0x3c   :  { %p1811_p13 = scmp.ne.s32.totalorder %s1949_s17, %s1810_s14  ;;  %p1816_p1 = scmp.lt.s32.totalorder %s1810_s14, %s1810_s14 }
  0x3e   :  { %p1817_p2 = por %p1816_p1, %p1815_p0 }
  0x40   :  { %p1818_p3 = pnand %p1817_p2, %p1811_p13 }
  0x42   :  { %1821 = shalt.err (!%p1818_p3)
}
  0x43   :  { %73 = dma.hbm_to_vmem [thread:$0]  %s2294_s7, 1024, %s1949_s17, [#allocation9], %s1854_s21, %s1854_s21, %s1855_s22  }
  0x44   :  { %1844 = dma.done.wait [#allocation3], 1024  }
  0x45   :  { %1845 = vsyncadd [#allocation3], 4294966272 }
  0x46   :  { %1846 = dma.done.wait [#allocation6], 2048  }
  0x47   :  { %1847 = vsyncadd [#allocation6], 4294965248 }
  0x48   :  { %1848 = dma.done.wait [#allocation9], 1024  }
  0x49   :  { %1849 = vsyncadd [#allocation9], 4294966272  ;;  %v1858_v0 = vmov 0   ;;  %v1686_v1 = vld [vmem:[%s2289_s2] sm:$0xff]   ;;  %v1992_v2 = vld [vmem:[%s2289_s2 + $0x8] sm:$0xff]  }
  0x4a   :  { %1684 = vset.pattern.permute.xlu0 %v1858_v0  ;;  %1685 = vset.pattern.permute.xlu1 %v1858_v0  ;;  %v1998_v3 = vld [vmem:[%s2289_s2 + $0x10] sm:$0xff]   ;;  %v2004_v4 = vld [vmem:[%s2289_s2 + $0x18] sm:$0xff]   ;;  %v2010_v5 = vld [vmem:[%s2287_s0] sm:$0xff]  }
  0x4b   :  { %1466 = vmatprep.subr.bf16.mxu0 %v1686_v1  ;;  %1514 = vmatprep.mubr.bf16.mxu1 %v1686_v1  ;;  %v2018_v6 = vld [vmem:[%s2289_s2 + $0x20] sm:$0xff]   ;;  %v2025_v7 = vld [vmem:[%s2289_s2 + $0x28] sm:$0xff]   ;;  %v123_v9 = vld [vmem:[%s2288_s1 + $0x10] sm:$0xff] }
  0x4c   :  { %1467 = vmatpush3.bf16.msra.mxu0 %v1686_v1  ;;  %1482 = vmatprep.mubr.bf16.mxu0 %v2010_v5  ;;  %v121_v8 = vld [vmem:[%s2288_s1] sm:$0xff]  ;;  %v122_v10 = vld [vmem:[%s2288_s1 + $0x8] sm:$0xff]  ;;  %v124_v11 = vld [vmem:[%s2288_s1 + $0x18] sm:$0xff] }
  0x4d   :  { %1468 = vmatprep.subr.bf16.mxu0 %v1992_v2  ;;  %332 = vperm.xlu0 %1684, %v121_v8   ;;  %v2044_v12 = vld [vmem:[%s2289_s2 + $0x30] sm:$0xff]   ;;  %v125_v13 = vld [vmem:[%s2288_s1 + $0x20] sm:$0xff]  ;;  %v126_v14 = vld [vmem:[%s2288_s1 + $0x28] sm:$0xff] }
  0x4e   :  { %342 = vperm.xlu1 %1685, %v123_v9   ;;  %v1702_v15 = vld [vmem:[#allocation5] sm:$0xff]   ;;  %v1703_v16 = vld [vmem:[#allocation5 + $0x8] sm:$0xff]   ;;  %v2057_v17 = vld [vmem:[%s2289_s2 + $0x38] sm:$0xff]  }
  0x4f   :  { %1498 = vmatprep.subr.bf16.mxu1 %v1702_v15  ;;  %v127_v18 = vld [vmem:[%s2288_s1 + $0x30] sm:$0xff]  ;;  %v128_v19 = vld [vmem:[%s2288_s1 + $0x38] sm:$0xff]  ;;  %v2070_v21 = vld [vmem:[%s2287_s0 + $0x8] sm:$0xff]  }
  0x50   :  { %1469 = vmatpush3.bf16.msra.mxu0 %v1992_v2  ;;  %1499 = vmatpush3.bf16.msra.mxu1 %v1702_v15  ;;  %v1704_v20 = vld [vmem:[#allocation5 + $0x10] sm:$0xff]   ;;  %v129_v23 = vld [vmem:[%s2288_s1 + $0x40] sm:$0xff]  ;;  %v130_v24 = vld [vmem:[%s2288_s1 + $0x48] sm:$0xff] }
  0x51   :  { %1470 = vmatprep.subr.bf16.mxu0 %v1998_v3  ;;  %337 = vperm.xlu0 %1684, %v122_v10   ;;  %v2075_v22 = vld [vmem:[%s2287_s0 + $0x10] sm:$0xff]   ;;  %v1705_v25 = vld [vmem:[#allocation5 + $0x18] sm:$0xff]   ;;  %v1706_v28 = vld [vmem:[#allocation5 + $0x20] sm:$0xff]  }
  0x52   :  { %347 = vperm.xlu1 %1685, %v124_v11   ;;  %1500 = vmatprep.subr.bf16.mxu1 %v1703_v16  ;;  %v131_v26 = vld [vmem:[%s2288_s1 + $0x50] sm:$0xff]  ;;  %v132_v27 = vld [vmem:[%s2288_s1 + $0x58] sm:$0xff]  ;;  %v133_v30 = vld [vmem:[%s2288_s1 + $0x60] sm:$0xff] }
  0x53   :  { %v2095_v29 = vld [vmem:[%s2287_s0 + $0x18] sm:$0xff]   ;;  %v134_v31 = vld [vmem:[%s2288_s1 + $0x68] sm:$0xff]  ;;  %v2106_v32 = vld [vmem:[%s2287_s0 + $0x20] sm:$0xff]  }
  0x54   :  { %1471 = vmatpush3.bf16.msra.mxu0 %v1998_v3  ;;  %1501 = vmatpush3.bf16.msra.mxu1 %v1703_v16  ;;  %v1707_v33 = vld [vmem:[#allocation5 + $0x28] sm:$0xff]   ;;  %v135_v34 = vld [vmem:[%s2288_s1 + $0x70] sm:$0xff]  ;;  %v136_v35 = vld [vmem:[%s2288_s1 + $0x78] sm:$0xff] }
  0x55   :  { %1472 = vmatprep.subr.bf16.mxu0 %v2004_v4  ;;  %352 = vperm.xlu0 %1684, %v125_v13   ;;  %v1708_v36 = vld [vmem:[#allocation5 + $0x30] sm:$0xff]   ;;  %v2119_v37 = vld [vmem:[%s2287_s0 + $0x28] sm:$0xff]   ;;  %v1709_v39 = vld [vmem:[#allocation5 + $0x38] sm:$0xff]  }
  0x56   :  { %357 = vperm.xlu1 %1685, %v126_v14   ;;  %1502 = vmatprep.subr.bf16.mxu1 %v1704_v20  ;;  %v2124_v38 = vld [vmem:[%s2287_s0 + $0x30] sm:$0xff]   ;;  %v1710_v40 = vld [vmem:[#allocation2] sm:$0xff]   ;;  %v2131_v41 = vld [vmem:[%s2287_s0 + $0x38] sm:$0xff]  }
  0x57   :  { %v1711_v42 = vld [vmem:[#allocation2 + $0x8] sm:$0xff]   ;;  %v1712_v43 = vld [vmem:[#allocation2 + $0x10] sm:$0xff]   ;;  %v1713_v44 = vld [vmem:[#allocation2 + $0x18] sm:$0xff]  }
  0x58   :  { %1473 = vmatpush3.bf16.msra.mxu0 %v2004_v4  ;;  %1503 = vmatpush3.bf16.msra.mxu1 %v1704_v20  ;;  %v1714_v45 = vld [vmem:[#allocation2 + $0x20] sm:$0xff]   ;;  %v1715_v46 = vld [vmem:[#allocation2 + $0x28] sm:$0xff]   ;;  %v1716_v47 = vld [vmem:[#allocation2 + $0x30] sm:$0xff]  }
  0x59   :  { %1474 = vmatprep.subr.bf16.mxu0 %v2018_v6  ;;  %362 = vperm.xlu0 %1684, %v127_v18   ;;  %v1717_v48 = vld [vmem:[#allocation2 + $0x38] sm:$0xff]   ;;  %v1718_v49 = vld [vmem:[#allocation7] sm:$0xff]   ;;  %v1719_v50 = vld [vmem:[#allocation7 + $0x8] sm:$0xff]  }
  0x5a   :  { %367 = vperm.xlu1 %1685, %v128_v19   ;;  %1504 = vmatprep.subr.bf16.mxu1 %v1705_v25  ;;  %v1720_v51 = vld [vmem:[#allocation7 + $0x10] sm:$0xff]   ;;  %v1721_v52 = vld [vmem:[#allocation7 + $0x18] sm:$0xff]   ;;  %v1722_v53 = vld [vmem:[#allocation7 + $0x20] sm:$0xff]  }
  0x5b   :  { %v1723_v54 = vld [vmem:[#allocation7 + $0x28] sm:$0xff]  }
  0x5c   :  { %1475 = vmatpush3.bf16.msra.mxu0 %v2018_v6  ;;  %1505 = vmatpush3.bf16.msra.mxu1 %v1705_v25 }
  0x5d   :  { %1476 = vmatprep.subr.bf16.mxu0 %v2025_v7  ;;  %372 = vperm.xlu0 %1684, %v129_v23  }
  0x5e   :  { %377 = vperm.xlu1 %1685, %v130_v24   ;;  %1506 = vmatprep.subr.bf16.mxu1 %v1706_v28 }
  0x60   :  { %1477 = vmatpush3.bf16.msra.mxu0 %v2025_v7  ;;  %1507 = vmatpush3.bf16.msra.mxu1 %v1706_v28 }
  0x61   :  { %1478 = vmatprep.subr.bf16.mxu0 %v2044_v12  ;;  %382 = vperm.xlu0 %1684, %v131_v26  }
  0x62   :  { %387 = vperm.xlu1 %1685, %v132_v27   ;;  %1508 = vmatprep.subr.bf16.mxu1 %v1707_v33 }
  0x64   :  { %1479 = vmatpush3.bf16.msra.mxu0 %v2044_v12  ;;  %1509 = vmatpush3.bf16.msra.mxu1 %v1707_v33 }
  0x65   :  { %1480 = vmatprep.subr.bf16.mxu0 %v2057_v17  ;;  %392 = vperm.xlu0 %1684, %v133_v30  }
  0x66   :  { %397 = vperm.xlu1 %1685, %v134_v31   ;;  %1510 = vmatprep.subr.bf16.mxu1 %v1708_v36 }
  0x68   :  { %1481 = vmatpush3.bf16.msra.mxu0 %v2057_v17  ;;  %1511 = vmatpush3.bf16.msra.mxu1 %v1708_v36 }
  0x69   :  { %402 = vperm.xlu0 %1684, %v135_v34   ;;  %1512 = vmatprep.subr.bf16.mxu1 %v1709_v39 }
  0x6a   :  { %407 = vperm.xlu1 %1685, %v136_v35   ;;  %1562 = vmatprep.subr.bf16.mxu0 %v1718_v49 }
  0x6b   :  { %1483 = vmatmul.mubr.bf16.vlgmr.msra.gmra.mrb[0].mxu0 %v2070_v21 }
  0x6c   :  { %1486 = vmatprep.mubr.bf16.mxu0 %v2075_v22  ;;  %1513 = vmatpush3.bf16.msra.mxu1 %v1709_v39 }
  0x6d   :  { %1530 = vmatprep.subr.bf16.mxu1 %v1710_v40  ;;  %1563 = vmatpush3.bf16.msra.mxu0 %v1718_v49 }
  0x6e   :  { %1564 = vmatprep.subr.bf16.mxu0 %v1719_v50 }
  0x6f   :  { %1515 = vmatmul.mubr.bf16.vlgmr.msra.gmra.mrb[0].mxu1 %v1992_v2 }
  0x70   :  { %1531 = vmatpush3.bf16.msra.mxu1 %v1710_v40  ;;  %1518 = vmatprep.mubr.bf16.mxu1 %v1998_v3 }
  0x71   :  { %1532 = vmatprep.subr.bf16.mxu1 %v1711_v42  ;;  %1565 = vmatpush3.bf16.msra.mxu0 %v1719_v50 }
  0x72   :  { %1566 = vmatprep.subr.bf16.mxu0 %v1720_v51 }
  0x73   :  { %1487 = vmatmul.mubr.bf16.gmra.mrb[4].mxu0 %v2095_v29 }
  0x74   :  { %1490 = vmatprep.mubr.bf16.mxu0 %v2106_v32  ;;  %1533 = vmatpush3.bf16.msra.mxu1 %v1711_v42 }
  0x75   :  { %1534 = vmatprep.subr.bf16.mxu1 %v1712_v43  ;;  %1567 = vmatpush3.bf16.msra.mxu0 %v1720_v51 }
  0x76   :  { %1568 = vmatprep.subr.bf16.mxu0 %v1721_v52 }
  0x77   :  { %1519 = vmatmul.mubr.bf16.gmra.mrb[4].mxu1 %v2004_v4 }
  0x78   :  { %1535 = vmatpush3.bf16.msra.mxu1 %v1712_v43  ;;  %1522 = vmatprep.mubr.bf16.mxu1 %v2018_v6 }
  0x79   :  { %1536 = vmatprep.subr.bf16.mxu1 %v1713_v44  ;;  %1569 = vmatpush3.bf16.msra.mxu0 %v1721_v52 }
  0x7a   :  { %1570 = vmatprep.subr.bf16.mxu0 %v1722_v53 }
  0x7b   :  { %1491 = vmatmul.mubr.bf16.gmra.mrb[8].mxu0 %v2119_v37 }
  0x7c   :  { %1494 = vmatprep.mubr.bf16.mxu0 %v2124_v38  ;;  %1537 = vmatpush3.bf16.msra.mxu1 %v1713_v44 }
  0x7d   :  { %1538 = vmatprep.subr.bf16.mxu1 %v1714_v45  ;;  %1571 = vmatpush3.bf16.msra.mxu0 %v1722_v53 }
  0x7e   :  { %1572 = vmatprep.subr.bf16.mxu0 %v1723_v54 }
  0x7f   :  { %1523 = vmatmul.mubr.bf16.gmra.mrb[8].mxu1 %v2025_v7 }
  0x80   :  { %1539 = vmatpush3.bf16.msra.mxu1 %v1714_v45  ;;  %1526 = vmatprep.mubr.bf16.mxu1 %v2044_v12 }
  0x81   :  { %1540 = vmatprep.subr.bf16.mxu1 %v1715_v46  ;;  %1573 = vmatpush3.bf16.msra.mxu0 %v1723_v54 }
  0x83   :  { %1495 = vmatmul.mubr.bf16.gmra.mrb[12].mxu0 %v2131_v41 }
  0x84   :  { %1541 = vmatpush3.bf16.msra.mxu1 %v1715_v46 }
  0x85   :  { %1542 = vmatprep.subr.bf16.mxu1 %v1716_v47 }
  0x87   :  { %1527 = vmatmul.mubr.bf16.gmra.mrb[12].mxu1 %v2057_v17 }
  0x88   :  { %1543 = vmatpush3.bf16.msra.mxu1 %v1716_v47 }
  0x89   :  { %1544 = vmatprep.subr.bf16.mxu1 %v1717_v48 }
  0x8c   :  { %1545 = vmatpush3.bf16.msra.mxu1 %v1717_v48 }
  0xcc   :  { %v2141_v55 = vpop.permute.xlu0 %332 }
  0xcd   :  { %v2143_v56 = vpop.permute.xlu1 %342 }
  0xd0   :  { %v2145_v57 = vpop.permute.xlu0 %337 }
  0xd1   :  { %v2147_v58 = vpop.permute.xlu1 %347 }
  0xd4   :  { %v2149_v59 = vpop.permute.xlu0 %352 }
  0xd5   :  { %v2151_v60 = vpop.permute.xlu1 %357 }
  0xd8   :  { %v2153_v62 = vpop.permute.xlu0 %362 }
  0xd9   :  { %v2155_v0 = vpop.permute.xlu1 %367 }
  0xdc   :  { %v2161_v10 = vpop.permute.xlu0 %372 }
  0xdd   :  { %v2163_v11 = vpop.permute.xlu1 %377 }
  0xe0   :  { %v2169_v20 = vpop.permute.xlu0 %382 }
  0xe1   :  { %v2171_v24 = vpop.permute.xlu1 %387 }
  0xe4   :  { %v2173_v30 = vpop.permute.xlu0 %392 }
  0xe5   :  { %v2177_v35 = vpop.permute.xlu1 %397 }
  0xe8   :  { %v2181_v44 = vpop.permute.xlu0 %402 }
  0xe9   :  { %v2183_v46 = vpop.permute.xlu1 %407 }
 0x13e   :  { %v1484_v61 = vpop.f32.mrb[0].mxu0 }
 0x13f   :  { %v267_v63 = vpop.f32.mrb[1].mxu0  ;;  %v412_v2 = vmul.f32 %v1484_v61, %v2143_v56  ;;  %v1724_v61 = vld [vmem:[#allocation7 + $0x30] sm:$0xff]  }
 0x140   :  { %v1485_v1 = vpop.f32.mrb[2].mxu0  ;;  %v410_v6 = vmul.f32 %v2141_v55, %v267_v63  ;;  %1574 = vmatprep.subr.bf16.mxu0 %v1724_v61  ;;  %v1725_v63 = vld [vmem:[#allocation7 + $0x38] sm:$0xff]  }
 0x141   :  { %v413_v3 = vmul.f32 %v1485_v1, %v2147_v58  ;;  %v270_v4 = vpop.f32.mrb[3].mxu0  ;;  %1575 = vmatpush3.bf16.msra.mxu0 %v1724_v61  ;;  %v1726_v1 = vld [vmem:[#allocation8] sm:$0xff]  }
 0x142   :  { %v411_v7 = vmul.f32 %v2145_v57, %v270_v4  ;;  %1576 = vmatprep.subr.bf16.mxu0 %v1725_v63 }
 0x143   :  { %v427_v8 = vpack.c.bf16 %v413_v3, %v412_v2  ;;  %v2193_v2 = vld [vmem:[%s2292_s5] ss:$0 sm:$0xff] }
 0x144   :  { %v426_v9 = vpack.c.bf16 %v411_v7, %v410_v6 }
 0x145   :  { %1577 = vmatpush3.bf16.msra.mxu0 %v1725_v63 }
 0x146   :  { %v1488_v12 = vpop.f32.mrb[4].mxu0  ;;  %1546 = vmatprep.mubr.bf16.mxu1 %v426_v9  ;;  %1594 = vmatprep.subr.bf16.mxu0 %v1726_v1 }
 0x147   :  { %v283_v13 = vpop.f32.mrb[5].mxu0  ;;  %1547 = vmatmul.mubr.bf16.vlgmr.msra.gmra.mrb[0].mxu1 %v427_v8  ;;  %v416_v15 = vmul.f32 %v1488_v12, %v2153_v62 }
 0x148   :  { %v1489_v14 = vpop.f32.mrb[6].mxu0  ;;  %v414_v18 = vmul.f32 %v2149_v59, %v283_v13 }
 0x149   :  { %v417_v16 = vmul.f32 %v1489_v14, %v2155_v0  ;;  %v286_v17 = vpop.f32.mrb[7].mxu0 }
 0x14a   :  { %v415_v19 = vmul.f32 %v2151_v60, %v286_v17 }
 0x14b   :  { %v429_v23 = vpack.c.bf16 %v417_v16, %v416_v15 }
 0x14c   :  { %v428_v25 = vpack.c.bf16 %v415_v19, %v414_v18 }
 0x14e   :  { %v1492_v26 = vpop.f32.mrb[8].mxu0  ;;  %1550 = vmatprep.mubr.bf16.mxu1 %v428_v25 }
 0x14f   :  { %v299_v27 = vpop.f32.mrb[9].mxu0  ;;  %1551 = vmatmul.mubr.bf16.gmra.mrb[4].mxu1 %v429_v23  ;;  %v420_v31 = vmul.f32 %v1492_v26, %v2169_v20  ;;  %v1727_v26 = vld [vmem:[#allocation8 + $0x8] sm:$0xff]  }
 0x150   :  { %v1493_v28 = vpop.f32.mrb[10].mxu0  ;;  %v418_v36 = vmul.f32 %v2161_v10, %v299_v27 }
 0x151   :  { %v421_v33 = vmul.f32 %v1493_v28, %v2171_v24  ;;  %v302_v34 = vpop.f32.mrb[11].mxu0 }
 0x152   :  { %v419_v39 = vmul.f32 %v2163_v11, %v302_v34 }
 0x153   :  { %v431_v40 = vpack.c.bf16 %v421_v33, %v420_v31 }
 0x154   :  { %v430_v42 = vpack.c.bf16 %v419_v39, %v418_v36 }
 0x156   :  { %v1496_v43 = vpop.f32.mrb[12].mxu0  ;;  %1554 = vmatprep.mubr.bf16.mxu1 %v430_v42 }
 0x157   :  { %v315_v45 = vpop.f32.mrb[13].mxu0  ;;  %1555 = vmatmul.mubr.bf16.gmra.mrb[8].mxu1 %v431_v40  ;;  %v424_v48 = vmul.f32 %v1496_v43, %v2181_v44  ;;  %v1728_v40 = vld [vmem:[#allocation8 + $0x10] sm:$0xff]  }
 0x158   :  { %v1497_v47 = vpop.f32.mrb[14].mxu0  ;;  %v422_v51 = vmul.f32 %v2173_v30, %v315_v45 }
 0x159   :  { %v425_v49 = vmul.f32 %v1497_v47, %v2183_v46  ;;  %v318_v50 = vpop.f32.mrb[15].mxu0 }
 0x15a   :  { %v423_v52 = vmul.f32 %v2177_v35, %v318_v50 }
 0x15b   :  { %v433_v53 = vpack.c.bf16 %v425_v49, %v424_v48 }
 0x15c   :  { %v432_v54 = vpack.c.bf16 %v423_v52, %v422_v51  ;;  %v1729_v51 = vld [vmem:[#allocation8 + $0x18] sm:$0xff]  }
 0x15e   :  { %1558 = vmatprep.mubr.bf16.mxu1 %v432_v54 }
 0x15f   :  { %1559 = vmatmul.mubr.bf16.gmra.mrb[12].mxu1 %v433_v53 }
 0x160   :  { %1642 = vmatprep.mubr.bf16.mxu1 %v2010_v5 }
 0x21a   :  { %v1548_v3 = vpop.f32.mrb[0].mxu1 }
 0x21b   :  { %v765_v4 = vadd.f32 %v1548_v3, %v2193_v2  ;;  %v693_v6 = vpop.f32.mrb[1].mxu1 }
 0x21c   :  { %v763_v7 = vadd.f32 %v2193_v2, %v693_v6  ;;  %v1549_v5 = vpop.f32.mrb[2].mxu1 }
 0x21d   :  { %v766_v8 = vadd.f32 %v1549_v5, %v2193_v2  ;;  %v696_v9 = vpop.f32.mrb[3].mxu1  ;;  %v781_v13 = vmax.f32 %v765_v4, 0.0  ;;  %v1730_v4 = vld [vmem:[#allocation8 + $0x20] sm:$0xff]  }
 0x21e   :  { %v764_v12 = vadd.f32 %v2193_v2, %v696_v9  ;;  %v779_v15 = vmax.f32 %v763_v7, 0.0 }
 0x21f   :  { %v782_v14 = vmax.f32 %v766_v8, 0.0 }
 0x220   :  { %v780_v16 = vmax.f32 %v764_v12, 0.0 }
 0x221   :  { %v2199_v17 = vpack.c.bf16 %v782_v14, %v781_v13  ;;  %v1731_v14 = vld [vmem:[#allocation8 + $0x28] sm:$0xff]  }
 0x222   :  { %v2201_v18 = vpack.c.bf16 %v780_v16, %v779_v15  ;;  %v1552_v19 = vpop.f32.mrb[4].mxu1 }
 0x223   :  { %v769_v23 = vadd.f32 %v1552_v19, %v2193_v2  ;;  %v709_v25 = vpop.f32.mrb[5].mxu1 }
 0x224   :  { %v767_v27 = vadd.f32 %v2193_v2, %v709_v25  ;;  %v1553_v28 = vpop.f32.mrb[6].mxu1  ;;  %1578 = vmatprep.mubr.bf16.mxu0 %v2201_v18 }
 0x225   :  { %v770_v31 = vadd.f32 %v1553_v28, %v2193_v2  ;;  %v712_v33 = vpop.f32.mrb[7].mxu1  ;;  %1579 = vmatmul.mubr.bf16.vlgmr.msra.gmra.mrb[16].mxu0 %v2199_v17  ;;  %v785_v36 = vmax.f32 %v769_v23, 0.0  ;;  %v1732_v28 = vld [vmem:[#allocation8 + $0x30] sm:$0xff]  }
 0x226   :  { %v768_v34 = vadd.f32 %v2193_v2, %v712_v33  ;;  %1595 = vmatpush3.bf16.msra.mxu0 %v1726_v1  ;;  %v783_v42 = vmax.f32 %v767_v27, 0.0 }
 0x227   :  { %v786_v39 = vmax.f32 %v770_v31, 0.0  ;;  %1596 = vmatprep.subr.bf16.mxu0 %v1727_v26 }
 0x228   :  { %v784_v43 = vmax.f32 %v768_v34, 0.0 }
 0x229   :  { %v798_v45 = vpack.c.bf16 %v786_v39, %v785_v36  ;;  %v1733_v39 = vld [vmem:[#allocation8 + $0x38] sm:$0xff]  }
 0x22a   :  { %v797_v47 = vpack.c.bf16 %v784_v43, %v783_v42  ;;  %v1556_v48 = vpop.f32.mrb[8].mxu1  ;;  %1597 = vmatpush3.bf16.msra.mxu0 %v1727_v26 }
 0x22b   :  { %v773_v49 = vadd.f32 %v1556_v48, %v2193_v2  ;;  %v725_v50 = vpop.f32.mrb[9].mxu1  ;;  %1598 = vmatprep.subr.bf16.mxu0 %v1728_v40 }
 0x22c   :  { %v771_v52 = vadd.f32 %v2193_v2, %v725_v50  ;;  %v1557_v53 = vpop.f32.mrb[10].mxu1  ;;  %1582 = vmatprep.mubr.bf16.mxu0 %v797_v47 }
 0x22d   :  { %v774_v54 = vadd.f32 %v1557_v53, %v2193_v2  ;;  %v728_v61 = vpop.f32.mrb[11].mxu1  ;;  %1583 = vmatmul.mubr.bf16.gmra.mrb[20].mxu0 %v798_v45  ;;  %v789_v1 = vmax.f32 %v773_v49, 0.0 }
 0x22e   :  { %v772_v63 = vadd.f32 %v2193_v2, %v728_v61  ;;  %1599 = vmatpush3.bf16.msra.mxu0 %v1728_v40  ;;  %v787_v6 = vmax.f32 %v771_v52, 0.0 }
 0x22f   :  { %v790_v3 = vmax.f32 %v774_v54, 0.0  ;;  %1600 = vmatprep.subr.bf16.mxu0 %v1729_v51 }
 0x230   :  { %v788_v7 = vmax.f32 %v772_v63, 0.0 }
 0x231   :  { %v800_v5 = vpack.c.bf16 %v790_v3, %v789_v1 }
 0x232   :  { %v799_v8 = vpack.c.bf16 %v788_v7, %v787_v6  ;;  %v1560_v9 = vpop.f32.mrb[12].mxu1  ;;  %1601 = vmatpush3.bf16.msra.mxu0 %v1729_v51 }
 0x233   :  { %v777_v12 = vadd.f32 %v1560_v9, %v2193_v2  ;;  %v741_v13 = vpop.f32.mrb[13].mxu1  ;;  %1602 = vmatprep.subr.bf16.mxu0 %v1730_v4 }
 0x234   :  { %v775_v15 = vadd.f32 %v2193_v2, %v741_v13  ;;  %v1561_v16 = vpop.f32.mrb[14].mxu1  ;;  %1586 = vmatprep.mubr.bf16.mxu0 %v799_v8 }
 0x235   :  { %v778_v19 = vadd.f32 %v1561_v16, %v2193_v2  ;;  %v744_v23 = vpop.f32.mrb[15].mxu1  ;;  %1587 = vmatmul.mubr.bf16.gmra.mrb[24].mxu0 %v800_v5  ;;  %v793_v26 = vmax.f32 %v777_v12, 0.0 }
 0x236   :  { %v776_v25 = vadd.f32 %v2193_v2, %v744_v23  ;;  %1603 = vmatpush3.bf16.msra.mxu0 %v1730_v4  ;;  %v791_v31 = vmax.f32 %v775_v15, 0.0 }
 0x237   :  { %v794_v27 = vmax.f32 %v778_v19, 0.0  ;;  %1604 = vmatprep.subr.bf16.mxu0 %v1731_v14 }
 0x238   :  { %v792_v33 = vmax.f32 %v776_v25, 0.0 }
 0x239   :  { %v802_v34 = vpack.c.bf16 %v794_v27, %v793_v26 }
 0x23a   :  { %v801_v36 = vpack.c.bf16 %v792_v33, %v791_v31  ;;  %1605 = vmatpush3.bf16.msra.mxu0 %v1731_v14 }
 0x23b   :  { %1606 = vmatprep.subr.bf16.mxu0 %v1732_v28 }
 0x23c   :  { %1590 = vmatprep.mubr.bf16.mxu0 %v801_v36 }
 0x23d   :  { %1591 = vmatmul.mubr.bf16.gmra.mrb[28].mxu0 %v802_v34 }
 0x23e   :  { %1607 = vmatpush3.bf16.msra.mxu0 %v1732_v28  ;;  %1610 = vmatprep.mubr.bf16.mxu0 %v2201_v18 }
 0x23f   :  { %1608 = vmatprep.subr.bf16.mxu0 %v1733_v39 }
 0x242   :  { %1609 = vmatpush3.bf16.msra.mxu0 %v1733_v39 }
 0x245   :  { %1611 = vmatmul.mubr.bf16.vlgmr.msra.gmra.mrb[32].mxu0 %v2199_v17 }
 0x246   :  { %1614 = vmatprep.mubr.bf16.mxu0 %v797_v47 }
 0x24d   :  { %1615 = vmatmul.mubr.bf16.gmra.mrb[36].mxu0 %v798_v45 }
 0x24e   :  { %1618 = vmatprep.mubr.bf16.mxu0 %v799_v8 }
 0x255   :  { %1619 = vmatmul.mubr.bf16.gmra.mrb[40].mxu0 %v800_v5 }
 0x256   :  { %1622 = vmatprep.mubr.bf16.mxu0 %v801_v36 }
 0x25d   :  { %1623 = vmatmul.mubr.bf16.gmra.mrb[44].mxu0 %v802_v34 }
 0x2f8   :  { %v1580_v2 = vpop.f32.mrb[16].mxu0 }
 0x2f9   :  { %v901_v40 = vpop.f32.mrb[17].mxu0 }
 0x2fa   :  { %v1581_v42 = vpop.f32.mrb[18].mxu0 }
 0x2fb   :  { %v965_v43 = vpack.c.bf16 %v1581_v42, %v1580_v2  ;;  %v904_v48 = vpop.f32.mrb[19].mxu0 }
 0x2fc   :  { %v964_v49 = vpack.c.bf16 %v904_v48, %v901_v40 }
 0x2fe   :  { %1626 = vmatprep.subr.bf16.mxu1 %v964_v49 }
 0x2ff   :  { %1627 = vmatpush3.bf16.msra.mxu1 %v964_v49 }
 0x300   :  { %v1584_v50 = vpop.f32.mrb[20].mxu0  ;;  %1628 = vmatprep.subr.bf16.mxu1 %v965_v43 }
 0x301   :  { %v917_v18 = vpop.f32.mrb[21].mxu0 }
 0x302   :  { %v1585_v51 = vpop.f32.mrb[22].mxu0 }
 0x303   :  { %v967_v52 = vpack.c.bf16 %v1585_v51, %v1584_v50  ;;  %v920_v17 = vpop.f32.mrb[23].mxu0  ;;  %1629 = vmatpush3.bf16.msra.mxu1 %v965_v43 }
 0x304   :  { %v966_v45 = vpack.c.bf16 %v920_v17, %v917_v18 }
 0x306   :  { %1630 = vmatprep.subr.bf16.mxu1 %v966_v45 }
 0x307   :  { %1631 = vmatpush3.bf16.msra.mxu1 %v966_v45 }
 0x308   :  { %v1588_v47 = vpop.f32.mrb[24].mxu0  ;;  %1632 = vmatprep.subr.bf16.mxu1 %v967_v52 }
 0x309   :  { %v933_v53 = vpop.f32.mrb[25].mxu0 }
 0x30a   :  { %v1589_v54 = vpop.f32.mrb[26].mxu0 }
 0x30b   :  { %v969_v61 = vpack.c.bf16 %v1589_v54, %v1588_v47  ;;  %v936_v63 = vpop.f32.mrb[27].mxu0  ;;  %1633 = vmatpush3.bf16.msra.mxu1 %v967_v52 }
 0x30c   :  { %v968_v1 = vpack.c.bf16 %v936_v63, %v933_v53 }
 0x30e   :  { %1634 = vmatprep.subr.bf16.mxu1 %v968_v1 }
 0x30f   :  { %1635 = vmatpush3.bf16.msra.mxu1 %v968_v1 }
 0x310   :  { %v1592_v3 = vpop.f32.mrb[28].mxu0  ;;  %1636 = vmatprep.subr.bf16.mxu1 %v969_v61 }
 0x311   :  { %v949_v4 = vpop.f32.mrb[29].mxu0 }
 0x312   :  { %v1593_v6 = vpop.f32.mrb[30].mxu0 }
 0x313   :  { %v971_v7 = vpack.c.bf16 %v1593_v6, %v1592_v3  ;;  %v952_v5 = vpop.f32.mrb[31].mxu0  ;;  %1637 = vmatpush3.bf16.msra.mxu1 %v969_v61 }
 0x314   :  { %v970_v8 = vpack.c.bf16 %v952_v5, %v949_v4 }
 0x316   :  { %1638 = vmatprep.subr.bf16.mxu1 %v970_v8 }
 0x317   :  { %1639 = vmatpush3.bf16.msra.mxu1 %v970_v8 }
 0x318   :  { %v1612_v9 = vpop.f32.mrb[32].mxu0  ;;  %1640 = vmatprep.subr.bf16.mxu1 %v971_v7 }
 0x319   :  { %v1070_v12 = vpop.f32.mrb[33].mxu0 }
 0x31a   :  { %v1613_v13 = vpop.f32.mrb[34].mxu0 }
 0x31b   :  { %v1073_v14 = vpop.f32.mrb[35].mxu0  ;;  %1641 = vmatpush3.bf16.msra.mxu1 %v971_v7 }
 0x31e   :  { %1643 = vmatmul.mubr.bf16.vlgmr.msra.gmra.mrb[16].mxu1 %v2070_v21 }
 0x31f   :  { %1646 = vmatprep.mubr.bf16.mxu1 %v2075_v22 }
 0x320   :  { %v1616_v15 = vpop.f32.mrb[36].mxu0 }
 0x321   :  { %v1086_v16 = vpop.f32.mrb[37].mxu0 }
 0x322   :  { %v1617_v19 = vpop.f32.mrb[38].mxu0 }
 0x323   :  { %v1089_v23 = vpop.f32.mrb[39].mxu0 }
 0x326   :  { %1647 = vmatmul.mubr.bf16.gmra.mrb[20].mxu1 %v2095_v29 }
 0x327   :  { %1650 = vmatprep.mubr.bf16.mxu1 %v2106_v32 }
 0x328   :  { %v1620_v25 = vpop.f32.mrb[40].mxu0 }
 0x329   :  { %v1102_v26 = vpop.f32.mrb[41].mxu0 }
 0x32a   :  { %v1621_v27 = vpop.f32.mrb[42].mxu0 }
 0x32b   :  { %v1105_v28 = vpop.f32.mrb[43].mxu0 }
 0x32e   :  { %1651 = vmatmul.mubr.bf16.gmra.mrb[24].mxu1 %v2119_v37  ;;  %v2238_v37 = vld [vmem:[%s2295_s8] ss:$0 sm:$0xff]  ;;  %s1859_s8 = smov [#allocation10]  }
 0x32f   :  { %1654 = vmatprep.mubr.bf16.mxu1 %v2124_v38  ;;  %s1306_s12 = sshll.u32 %s1859_s8, 4  ;;  %s1307_s12 = int_to_ptr.vmem [resolvable:$true] %s1306_s12 }
 0x330   :  { %v2225_v31 = vpop.f32.mrb[44].mxu0  ;;  %s1822_s27 = scalar_lea.vmem %s1307_s12, 2048  ;;  %p1827_p5 = scmp.lt.s32.totalorder %s1307_s12, %s1307_s12 }
 0x331   :  { %v2227_v21 = vpop.f32.mrb[45].mxu0  ;;  %p1823_p4 = scmp.ne.s32.totalorder %s1307_s12, %s1822_s27  ;;  %p1828_p6 = scmp.lt.s32.totalorder %s1822_s27, %s1822_s27 }
 0x332   :  { %v2229_v22 = vpop.f32.mrb[46].mxu0 }
 0x333   :  { %v2231_v33 = vpop.f32.mrb[47].mxu0  ;;  %p1829_p7 = por %p1828_p6, %p1827_p5 }
 0x335   :  { %p1830_p8 = pnand %p1829_p7, %p1823_p4 }
 0x336   :  { %1655 = vmatmul.mubr.bf16.gmra.mrb[28].mxu1 %v2131_v41 }
 0x3f1   :  { %v1644_v29 = vpop.f32.mrb[16].mxu1 }
 0x3f2   :  { %v1232_v32 = vmul.f32 %v1644_v29, %v2143_v56  ;;  %v1167_v34 = vpop.f32.mrb[17].mxu1 }
 0x3f3   :  { %v1230_v38 = vmul.f32 %v1167_v34, %v2141_v55  ;;  %v1645_v36 = vpop.f32.mrb[18].mxu1 }
 0x3f4   :  { %v1248_v39 = vadd.f32 %v1612_v9, %v1232_v32  ;;  %v1233_v2 = vmul.f32 %v1645_v36, %v2147_v58  ;;  %v1170_v40 = vpop.f32.mrb[19].mxu1 }
 0x3f5   :  { %v1246_v42 = vadd.f32 %v1230_v38, %v1070_v12  ;;  %v1231_v43 = vmul.f32 %v1170_v40, %v2145_v57 }
 0x3f6   :  { %v1271_v41 = vadd.f32 %v2238_v37, %v1248_v39  ;;  %v1249_v48 = vadd.f32 %v1613_v13, %v1233_v2 }
 0x3f7   :  { %v1269_v56 = vadd.f32 %v2238_v37, %v1246_v42  ;;  %v1247_v49 = vadd.f32 %v1231_v43, %v1073_v14 }
 0x3f8   :  { %1287 = vst [vmem:[#allocation10 + $0x10] sm:$0xff] %v1271_v41  ;;  %v1272_v50 = vadd.f32 %v2238_v37, %v1249_v48 }
 0x3f9   :  { %1285 = vst [vmem:[#allocation10] sm:$0xff] %v1269_v56  ;;  %v1270_v55 = vadd.f32 %v2238_v37, %v1247_v49  ;;  %v1648_v18 = vpop.f32.mrb[20].mxu1 }
 0x3fa   :  { %1288 = vst [vmem:[#allocation10 + $0x18] sm:$0xff] %v1272_v50  ;;  %v1236_v58 = vmul.f32 %v1648_v18, %v2153_v62  ;;  %v1183_v51 = vpop.f32.mrb[21].mxu1 }
 0x3fb   :  { %1286 = vst [vmem:[#allocation10 + $0x8] sm:$0xff] %v1270_v55  ;;  %v1234_v57 = vmul.f32 %v1183_v51, %v2149_v59  ;;  %v1649_v52 = vpop.f32.mrb[22].mxu1 }
 0x3fc   :  { %v1252_v17 = vadd.f32 %v1616_v15, %v1236_v58  ;;  %v1237_v45 = vmul.f32 %v1649_v52, %v2155_v0  ;;  %v1186_v47 = vpop.f32.mrb[23].mxu1 }
 0x3fd   :  { %v1250_v53 = vadd.f32 %v1234_v57, %v1086_v16  ;;  %v1235_v54 = vmul.f32 %v1186_v47, %v2151_v60 }
 0x3fe   :  { %v1275_v61 = vadd.f32 %v2238_v37, %v1252_v17  ;;  %v1253_v63 = vadd.f32 %v1617_v19, %v1237_v45 }
 0x3ff   :  { %v1273_v1 = vadd.f32 %v2238_v37, %v1250_v53  ;;  %v1251_v3 = vadd.f32 %v1235_v54, %v1089_v23 }
 0x400   :  { %1291 = vst [vmem:[#allocation10 + $0x30] sm:$0xff] %v1275_v61  ;;  %v1276_v62 = vadd.f32 %v2238_v37, %v1253_v63 }
 0x401   :  { %1289 = vst [vmem:[#allocation10 + $0x20] sm:$0xff] %v1273_v1  ;;  %v1274_v59 = vadd.f32 %v2238_v37, %v1251_v3  ;;  %v1652_v4 = vpop.f32.mrb[24].mxu1 }
 0x402   :  { %1292 = vst [vmem:[#allocation10 + $0x38] sm:$0xff] %v1276_v62  ;;  %v1240_v0 = vmul.f32 %v1652_v4, %v2169_v20  ;;  %v1199_v6 = vpop.f32.mrb[25].mxu1 }
 0x403   :  { %1290 = vst [vmem:[#allocation10 + $0x28] sm:$0xff] %v1274_v59  ;;  %v1238_v60 = vmul.f32 %v1199_v6, %v2161_v10  ;;  %v1653_v7 = vpop.f32.mrb[26].mxu1 }
 0x404   :  { %v1256_v5 = vadd.f32 %v1620_v25, %v1240_v0  ;;  %v1241_v8 = vmul.f32 %v1653_v7, %v2171_v24  ;;  %v1202_v9 = vpop.f32.mrb[27].mxu1 }
 0x405   :  { %v1254_v12 = vadd.f32 %v1238_v60, %v1102_v26  ;;  %v1239_v13 = vmul.f32 %v1202_v9, %v2163_v11 }
 0x406   :  { %v1279_v14 = vadd.f32 %v2238_v37, %v1256_v5  ;;  %v1257_v15 = vadd.f32 %v1621_v27, %v1241_v8 }
 0x407   :  { %v1277_v16 = vadd.f32 %v2238_v37, %v1254_v12  ;;  %v1255_v19 = vadd.f32 %v1239_v13, %v1105_v28 }
 0x408   :  { %1295 = vst [vmem:[#allocation10 + $0x50] sm:$0xff] %v1279_v14  ;;  %v1280_v20 = vadd.f32 %v2238_v37, %v1257_v15 }
 0x409   :  { %1293 = vst [vmem:[#allocation10 + $0x40] sm:$0xff] %v1277_v16  ;;  %v1278_v10 = vadd.f32 %v2238_v37, %v1255_v19  ;;  %v1656_v23 = vpop.f32.mrb[28].mxu1 }
 0x40a   :  { %1296 = vst [vmem:[#allocation10 + $0x58] sm:$0xff] %v1280_v20  ;;  %v1244_v24 = vmul.f32 %v1656_v23, %v2181_v44  ;;  %v1215_v25 = vpop.f32.mrb[29].mxu1 }
 0x40b   :  { %1294 = vst [vmem:[#allocation10 + $0x48] sm:$0xff] %v1278_v10  ;;  %v1242_v11 = vmul.f32 %v1215_v25, %v2173_v30  ;;  %v1657_v26 = vpop.f32.mrb[30].mxu1 }
 0x40c   :  { %v1260_v27 = vadd.f32 %v2225_v31, %v1244_v24  ;;  %v1245_v29 = vmul.f32 %v1657_v26, %v2183_v46  ;;  %v1218_v28 = vpop.f32.mrb[31].mxu1 }
 0x40d   :  { %v1258_v32 = vadd.f32 %v1242_v11, %v2227_v21  ;;  %v1243_v34 = vmul.f32 %v1218_v28, %v2177_v35 }
 0x40e   :  { %v1283_v38 = vadd.f32 %v2238_v37, %v1260_v27  ;;  %v1261_v44 = vadd.f32 %v2229_v22, %v1245_v29 }
 0x40f   :  { %v1281_v36 = vadd.f32 %v2238_v37, %v1258_v32  ;;  %v1259_v30 = vadd.f32 %v1243_v34, %v2231_v33 }
 0x410   :  { %1299 = vst [vmem:[#allocation10 + $0x70] sm:$0xff] %v1283_v38  ;;  %v1284_v31 = vadd.f32 %v2238_v37, %v1261_v44 }
 0x411   :  { %1297 = vst [vmem:[#allocation10 + $0x60] sm:$0xff] %v1281_v36  ;;  %v1282_v46 = vadd.f32 %v2238_v37, %v1259_v30 }
 0x412   :  { %1300 = vst [vmem:[#allocation10 + $0x78] sm:$0xff] %v1284_v31 }
 0x413   :  { %1298 = vst [vmem:[#allocation10 + $0x68] sm:$0xff] %v1282_v46 }
 0x414   :  { %1833 = shalt.err (!%p1830_p8)
}
 0x415   :  { %s1834_s30 = scalar_lea.hbm %s2296_s9, 2048 }
 0x416   :  { %p1835_p9 = scmp.ne.s32.totalorder %s2296_s9, %s1834_s30  ;;  %p1838_p10 = scmp.lt.u32.totalorder %s1834_s30, %s2296_s9 }
 0x418   :  { %p1840_p11 = pnand %p1838_p10, %p1835_p9 }
 0x41a   :  { %1843 = shalt.err (!%p1840_p11)
}
 0x41b   :  { %s1860_s14 = smov 128   ;;  %s1861_s6 = smov 8  }
 0x41c   :  { %1312 = dma.vmem_to_hbm [thread:$0]  %s1307_s12, 2048, %s2296_s9, [#allocation4], %s1860_s14, %s1860_s14, %s1861_s6  }
 0x41d   :  { %1850 = dma.done.wait [#allocation4], 2048  }
 0x41e   :  { %1851 = vsyncadd [#allocation4], 4294965248 }
 0x41f   :  { %1316 = vsyncpa [#allocation3], 1 }
 0x420   :  { %1317 = vsyncpa [#allocation6], 1 }
 0x421   :  { %1318 = vsyncpa [#allocation9], 1 }
 0x422   :  { %1319 = vsyncpa [#allocation4], 1 }

</bundles_post_ra>
